<compile_context>
chip_gen: v6e
topology: v6e:2x2x1
jax: 0.10.0
libtpu: 0.0.40
codegen_flags: <defaults>
</compile_context>

<pallas_src>
import functools

import jax
import jax.numpy as jnp
import numpy as np
from jax.experimental import pallas as pl
from jax.experimental.pallas import tpu as pltpu

_LANES = 128
_TM_MAX = 512          # streaming sublane-tile: ~2.5 MiB VMEM double-buffered


def _round_up(v, m):
  return ((v + m - 1) // m) * m


def _recip(x):
  """1/x via EUP approximate reciprocal + one Newton step on the VALU.

  Guards (cheap selects) so edge cases match exact division:
    x == 0        -> +inf   (atan big-branch then yields +/- pi/2)
    x >= 1e30/inf -> 0      (the Newton step would otherwise produce NaN)
  """
  r = pl.reciprocal(x, approx=True)
  rn = r * (2.0 - x * r)                      # one Newton refinement
  rn = jnp.where(x >= 1e30, jnp.float32(0.0), rn)
  return jnp.where(x == 0.0, jnp.float32(jnp.inf), rn)


def _atan(t):
  """Elementwise arctan (Cephes atanf argument reduction + polynomial)."""
  a = jnp.abs(t)
  big = a > 2.414213562373095            # tan(3*pi/8)
  mid = a > 0.4142135623730951           # tan(pi/8)
  x = jnp.where(big, -_recip(a),
                jnp.where(mid, (a - 1.0) * _recip(a + 1.0), a))
  y0 = jnp.where(big, jnp.float32(np.pi / 2),
                 jnp.where(mid, jnp.float32(np.pi / 4), jnp.float32(0.0)))
  z = x * x
  p = (((8.05374449538e-2 * z - 1.38776856032e-1) * z
        + 1.99777106478e-1) * z - 3.33329491539e-1)
  res = y0 + p * z * x + x
  return jnp.where(t < 0.0, -res, res)


def _dest_step_kernel(pts_ref, rot_ref, trans_ref, out_ref, *,
                      output_height, motor_step):
  # pts_ref: (3, TM, 128) VMEM;  rot_ref: (3, 3) SMEM;  trans_ref: (3,) SMEM
  px = pts_ref[0]                               # (TM, 128) full-vreg tiles
  py = pts_ref[1]
  pz = pts_ref[2]

  def rotated_row(i):                           # h_i = (R @ p)_i + t_i
    return (rot_ref[i, 0] * px + rot_ref[i, 1] * py
            + rot_ref[i, 2] * pz + trans_ref[i])

  hx = rotated_row(0)
  hy = rotated_row(1)
  hz = rotated_row(2)

  oh = jnp.float32(output_height)
  # fold the /2 and /(2*pi)*motor_step factors into a single multiply
  scale = jnp.float32(0.5 * motor_step / (2.0 * np.pi))

  y_oh = hy + oh
  y_ = jnp.sqrt(y_oh * y_oh + hz * hz) + oh     # strictly > 0 for oh > 0
  # arcsin(a / sqrt(a^2 + b^2)) == atan(a / b)   for b >= 0
  out_ref[0] = _atan(hx * _recip(y_)) * scale           # deg_1
  x_ = jnp.sqrt(hx * hx + hz * hz)
  out_ref[1] = _atan(y_oh * _recip(x_)) * scale          # deg_2


def _rotation_from_euler(r):
  # TODO(synk): `euler2matrix` is not defined in the provided source; we assume
  # the standard ZYX euler rotation (Rz @ Ry @ Rx) applied to each point.
  cx, sx = jnp.cos(r[0]), jnp.sin(r[0])
  cy, sy = jnp.cos(r[1]), jnp.sin(r[1])
  cz, sz = jnp.cos(r[2]), jnp.sin(r[2])
  one, zero = jnp.float32(1.0), jnp.float32(0.0)
  rx = jnp.stack([jnp.stack([one, zero, zero]),
                  jnp.stack([zero, cx, -sx]),
                  jnp.stack([zero, sx, cx])])
  ry = jnp.stack([jnp.stack([cy, zero, sy]),
                  jnp.stack([zero, one, zero]),
                  jnp.stack([-sy, zero, cy])])
  rz = jnp.stack([jnp.stack([cz, -sz, zero]),
                  jnp.stack([sz, cz, zero]),
                  jnp.stack([zero, zero, one])])
  return (rz @ ry @ rx).astype(jnp.float32)


@functools.partial(jax.jit, static_argnames=("output_height", "motor_step"))
def dest_step_forward(x, r, t, *, output_height, motor_step):
  """Pallas implementation of DestStep.forward.  x: (B, N, 3) float32 points."""
  x = x.astype(jnp.float32)
  rot = _rotation_from_euler(r.astype(jnp.float32))     # (3, 3)
  trans = t.astype(jnp.float32)                         # (3,)

  pts = x[0]                        # module uses batch element 0 only
  n = pts.shape[0]

  # Tile policy: M = #(128-lane rows).  Small inputs -> one block; medium ->
  # at least 2 grid steps (feeds both v7x TensorCores); large -> TM=512 stream.
  m = _round_up(n, _LANES) // _LANES
  if m <= 8:
    tm = m
  elif m <= 2 * _TM_MAX:
    tm = _round_up((m + 1) // 2, 8)
  else:
    tm = _TM_MAX
  m_pad = _round_up(m, tm)
  n_pad = m_pad * _LANES

  # Single fused pad + reshape under jit (no zeros+scatter extra HBM pass).
  pts_t = jnp.pad(pts.T, ((0, 0), (0, n_pad - n))).reshape(3, m_pad, _LANES)

  kernel = functools.partial(_dest_step_kernel,
                             output_height=float(output_height),
                             motor_step=float(motor_step))
  out = pl.pallas_call(
      kernel,
      out_shape=jax.ShapeDtypeStruct((2, m_pad, _LANES), jnp.float32),
      grid=(m_pad // tm,),
      in_specs=[
          pl.BlockSpec((3, tm, _LANES), lambda i: (0, i, 0)),
          pl.BlockSpec(memory_space=pltpu.MemorySpace.SMEM),
          pl.BlockSpec(memory_space=pltpu.MemorySpace.SMEM),
      ],
      out_specs=pl.BlockSpec((2, tm, _LANES), lambda i: (0, i, 0)),
      compiler_params=pltpu.CompilerParams(
          dimension_semantics=("parallel",)),
  )(pts_t, rot, trans)

  # (N, 2)  == torch.t(torch.vstack((deg_1, deg_2)))
  return out.reshape(2, n_pad)[:, :n].T


def _reference(x, r, t, output_height, motor_step):
  """Pure-JAX reference mirroring the PyTorch forward exactly."""
  rot = _rotation_from_euler(r.astype(jnp.float32))
  h = x[0].astype(jnp.float32) @ rot.T + t.astype(jnp.float32)
  xx, yy, zz = h[:, 0], h[:, 1], h[:, 2]
  oh = output_height
  y_ = jnp.sqrt((yy + oh) ** 2 + zz ** 2) + oh
  deg1 = jnp.arcsin(xx / jnp.sqrt(y_ ** 2 + xx ** 2)) / 2
  x_ = jnp.sqrt(xx ** 2 + zz ** 2)
  deg2 = jnp.arcsin((yy + oh) / jnp.sqrt(x_ ** 2 + (yy + oh) ** 2)) / 2
  deg1 = deg1 / (2 * jnp.pi) * motor_step
  deg2 = deg2 / (2 * jnp.pi) * motor_step
  return jnp.stack([deg1, deg2], axis=1)


if __name__ == "__main__":
  key = jax.random.PRNGKey(0)
  kx, kr, kt, kx2 = jax.random.split(key, 4)
  output_height, motor_step = 1.5, 4096.0

  # Small-shape primary check (matches the module: batch of point clouds).
  B, N = 2, 8
  x = jax.random.normal(kx, (B, N, 3), dtype=jnp.float32)
  # Module __init__ initializes r, t to zeros(3); use small deterministic
  # perturbations so the rotation/translation path is exercised non-trivially.
  r = 0.1 * jax.random.normal(kr, (3,), dtype=jnp.float32)
  t = 0.1 * jax.random.normal(kt, (3,), dtype=jnp.float32)

  out = dest_step_forward(x, r, t,
                          output_height=output_height, motor_step=motor_step)
  out = jax.block_until_ready(out)
  assert out.shape == (N, 2)
  ref = _reference(x, r, t, output_height, motor_step)
  np.testing.assert_allclose(np.asarray(out), np.asarray(ref),
                             rtol=1e-4, atol=5e-3)

  # Second check exercising the multi-row / multi-grid-step tiled path.
  N2 = 3000
  x2 = jax.random.normal(kx2, (1, N2, 3), dtype=jnp.float32)
  out2 = dest_step_forward(x2, r, t,
                           output_height=output_height, motor_step=motor_step)
  out2 = jax.block_until_ready(out2)
  assert out2.shape == (N2, 2)
  ref2 = _reference(x2, r, t, output_height, motor_step)
  np.testing.assert_allclose(np.asarray(out2), np.asarray(ref2),
                             rtol=1e-4, atol=5e-3)

  print("KERNEL_OK")
</pallas_src>

<mosaic_0001>
module attributes {stable_mosaic.version = 11 : i64} {
  func.func @_dest_step_kernel(%arg0: i32, %arg1: memref<3x1x128xf32, #tpu.memory_space<vmem>>, %arg2: memref<3x3xf32, #tpu.memory_space<smem>>, %arg3: memref<3xf32, #tpu.memory_space<smem>>, %arg4: memref<2x1x128xf32, #tpu.memory_space<vmem>>) attributes {dimension_semantics = [#tpu.dimension_semantics<parallel>], iteration_bounds = array<i64: 1>, scalar_prefetch = 0 : i64, scratch_operands = 0 : i64, tpu.core_type = #tpu.core_type<tc>, window_params = [{transform_indices = @transform_0, window_bounds = array<i64: 3, 1, 128>}, {transform_indices = @transform_1, window_bounds = array<i64: 3, 3>}, {transform_indices = @transform_2, window_bounds = array<i64: 3>}, {transform_indices = @transform_3, window_bounds = array<i64: 2, 1, 128>}]} {
    %c0 = arith.constant 0 : index
    %c0_0 = arith.constant 0 : index
    %c0_1 = arith.constant 0 : index
    %0 = vector.load %arg1[%c0, %c0_0, %c0_1] : memref<3x1x128xf32, #tpu.memory_space<vmem>>, vector<1x1x128xf32>
    %1 = vector.shape_cast %0 : vector<1x1x128xf32> to vector<1x128xf32>
    %c1 = arith.constant 1 : index
    %c0_2 = arith.constant 0 : index
    %c0_3 = arith.constant 0 : index
    %2 = vector.load %arg1[%c1, %c0_2, %c0_3] : memref<3x1x128xf32, #tpu.memory_space<vmem>>, vector<1x1x128xf32>
    %3 = vector.shape_cast %2 : vector<1x1x128xf32> to vector<1x128xf32>
    %c2 = arith.constant 2 : index
    %c0_4 = arith.constant 0 : index
    %c0_5 = arith.constant 0 : index
    %4 = vector.load %arg1[%c2, %c0_4, %c0_5] : memref<3x1x128xf32, #tpu.memory_space<vmem>>, vector<1x1x128xf32>
    %5 = vector.shape_cast %4 : vector<1x1x128xf32> to vector<1x128xf32>
    %c0_6 = arith.constant 0 : index
    %c0_7 = arith.constant 0 : index
    %6 = memref.load %arg2[%c0_6, %c0_7] : memref<3x3xf32, #tpu.memory_space<smem>>
    %7 = vector.broadcast %6 : f32 to vector<1x128xf32>
    %8 = arith.mulf %7, %1 : vector<1x128xf32>
    %c0_8 = arith.constant 0 : index
    %c1_9 = arith.constant 1 : index
    %9 = memref.load %arg2[%c0_8, %c1_9] : memref<3x3xf32, #tpu.memory_space<smem>>
    %10 = vector.broadcast %9 : f32 to vector<1x128xf32>
    %11 = arith.mulf %10, %3 : vector<1x128xf32>
    %12 = arith.addf %8, %11 : vector<1x128xf32>
    %c0_10 = arith.constant 0 : index
    %c2_11 = arith.constant 2 : index
    %13 = memref.load %arg2[%c0_10, %c2_11] : memref<3x3xf32, #tpu.memory_space<smem>>
    %14 = vector.broadcast %13 : f32 to vector<1x128xf32>
    %15 = arith.mulf %14, %5 : vector<1x128xf32>
    %16 = arith.addf %12, %15 : vector<1x128xf32>
    %c0_12 = arith.constant 0 : index
    %17 = memref.load %arg3[%c0_12] : memref<3xf32, #tpu.memory_space<smem>>
    %18 = vector.broadcast %17 : f32 to vector<1x128xf32>
    %19 = arith.addf %16, %18 : vector<1x128xf32>
    %c1_13 = arith.constant 1 : index
    %c0_14 = arith.constant 0 : index
    %20 = memref.load %arg2[%c1_13, %c0_14] : memref<3x3xf32, #tpu.memory_space<smem>>
    %21 = vector.broadcast %20 : f32 to vector<1x128xf32>
    %22 = arith.mulf %21, %1 : vector<1x128xf32>
    %c1_15 = arith.constant 1 : index
    %c1_16 = arith.constant 1 : index
    %23 = memref.load %arg2[%c1_15, %c1_16] : memref<3x3xf32, #tpu.memory_space<smem>>
    %24 = vector.broadcast %23 : f32 to vector<1x128xf32>
    %25 = arith.mulf %24, %3 : vector<1x128xf32>
    %26 = arith.addf %22, %25 : vector<1x128xf32>
    %c1_17 = arith.constant 1 : index
    %c2_18 = arith.constant 2 : index
    %27 = memref.load %arg2[%c1_17, %c2_18] : memref<3x3xf32, #tpu.memory_space<smem>>
    %28 = vector.broadcast %27 : f32 to vector<1x128xf32>
    %29 = arith.mulf %28, %5 : vector<1x128xf32>
    %30 = arith.addf %26, %29 : vector<1x128xf32>
    %c1_19 = arith.constant 1 : index
    %31 = memref.load %arg3[%c1_19] : memref<3xf32, #tpu.memory_space<smem>>
    %32 = vector.broadcast %31 : f32 to vector<1x128xf32>
    %33 = arith.addf %30, %32 : vector<1x128xf32>
    %c2_20 = arith.constant 2 : index
    %c0_21 = arith.constant 0 : index
    %34 = memref.load %arg2[%c2_20, %c0_21] : memref<3x3xf32, #tpu.memory_space<smem>>
    %35 = vector.broadcast %34 : f32 to vector<1x128xf32>
    %36 = arith.mulf %35, %1 : vector<1x128xf32>
    %c2_22 = arith.constant 2 : index
    %c1_23 = arith.constant 1 : index
    %37 = memref.load %arg2[%c2_22, %c1_23] : memref<3x3xf32, #tpu.memory_space<smem>>
    %38 = vector.broadcast %37 : f32 to vector<1x128xf32>
    %39 = arith.mulf %38, %3 : vector<1x128xf32>
    %40 = arith.addf %36, %39 : vector<1x128xf32>
    %c2_24 = arith.constant 2 : index
    %c2_25 = arith.constant 2 : index
    %41 = memref.load %arg2[%c2_24, %c2_25] : memref<3x3xf32, #tpu.memory_space<smem>>
    %42 = vector.broadcast %41 : f32 to vector<1x128xf32>
    %43 = arith.mulf %42, %5 : vector<1x128xf32>
    %44 = arith.addf %40, %43 : vector<1x128xf32>
    %c2_26 = arith.constant 2 : index
    %45 = memref.load %arg3[%c2_26] : memref<3xf32, #tpu.memory_space<smem>>
    %46 = vector.broadcast %45 : f32 to vector<1x128xf32>
    %47 = arith.addf %44, %46 : vector<1x128xf32>
    %cst = arith.constant 1.500000e+00 : f32
    %48 = vector.broadcast %cst : f32 to vector<1x128xf32>
    %49 = arith.addf %33, %48 : vector<1x128xf32>
    %50 = arith.mulf %49, %49 : vector<1x128xf32>
    %51 = arith.mulf %47, %47 : vector<1x128xf32>
    %52 = arith.addf %50, %51 : vector<1x128xf32>
    %53 = math.sqrt %52 : vector<1x128xf32>
    %cst_27 = arith.constant 1.500000e+00 : f32
    %54 = vector.broadcast %cst_27 : f32 to vector<1x128xf32>
    %55 = arith.addf %53, %54 : vector<1x128xf32>
    %56 = tpu.reciprocal %55 {approx = true} : vector<1x128xf32> -> vector<1x128xf32>
    %57 = arith.mulf %55, %56 : vector<1x128xf32>
    %cst_28 = arith.constant 2.000000e+00 : f32
    %58 = vector.broadcast %cst_28 : f32 to vector<1x128xf32>
    %59 = arith.subf %58, %57 : vector<1x128xf32>
    %60 = arith.mulf %56, %59 : vector<1x128xf32>
    %cst_29 = arith.constant 1.000000e+30 : f32
    %61 = vector.broadcast %cst_29 : f32 to vector<1x128xf32>
    %62 = arith.cmpf oge, %55, %61 : vector<1x128xf32>
    %cst_30 = arith.constant 0.000000e+00 : f32
    %63 = vector.broadcast %cst_30 : f32 to vector<1x128xf32>
    %64 = arith.select %62, %63, %60 : vector<1x128xi1>, vector<1x128xf32>
    %cst_31 = arith.constant 0.000000e+00 : f32
    %65 = vector.broadcast %cst_31 : f32 to vector<1x128xf32>
    %66 = arith.cmpf oeq, %55, %65 : vector<1x128xf32>
    %cst_32 = arith.constant 0x7F800000 : f32
    %67 = vector.broadcast %cst_32 : f32 to vector<1x128xf32>
    %68 = arith.select %66, %67, %64 : vector<1x128xi1>, vector<1x128xf32>
    %69 = arith.mulf %19, %68 : vector<1x128xf32>
    %70 = math.absf %69 : vector<1x128xf32>
    %cst_33 = arith.constant 2.41421366 : f32
    %71 = vector.broadcast %cst_33 : f32 to vector<1x128xf32>
    %72 = arith.cmpf ogt, %70, %71 : vector<1x128xf32>
    %cst_34 = arith.constant 0.414213568 : f32
    %73 = vector.broadcast %cst_34 : f32 to vector<1x128xf32>
    %74 = arith.cmpf ogt, %70, %73 : vector<1x128xf32>
    %75 = tpu.reciprocal %70 {approx = true} : vector<1x128xf32> -> vector<1x128xf32>
    %76 = arith.mulf %70, %75 : vector<1x128xf32>
    %cst_35 = arith.constant 2.000000e+00 : f32
    %77 = vector.broadcast %cst_35 : f32 to vector<1x128xf32>
    %78 = arith.subf %77, %76 : vector<1x128xf32>
    %79 = arith.mulf %75, %78 : vector<1x128xf32>
    %cst_36 = arith.constant 1.000000e+30 : f32
    %80 = vector.broadcast %cst_36 : f32 to vector<1x128xf32>
    %81 = arith.cmpf oge, %70, %80 : vector<1x128xf32>
    %cst_37 = arith.constant 0.000000e+00 : f32
    %82 = vector.broadcast %cst_37 : f32 to vector<1x128xf32>
    %83 = arith.select %81, %82, %79 : vector<1x128xi1>, vector<1x128xf32>
    %cst_38 = arith.constant 0.000000e+00 : f32
    %84 = vector.broadcast %cst_38 : f32 to vector<1x128xf32>
    %85 = arith.cmpf oeq, %70, %84 : vector<1x128xf32>
    %cst_39 = arith.constant 0x7F800000 : f32
    %86 = vector.broadcast %cst_39 : f32 to vector<1x128xf32>
    %87 = arith.select %85, %86, %83 : vector<1x128xi1>, vector<1x128xf32>
    %cst_40 = arith.constant 0.000000e+00 : f32
    %88 = vector.broadcast %cst_40 : f32 to vector<1x128xf32>
    %89 = arith.subf %88, %87 : vector<1x128xf32>
    %cst_41 = arith.constant 1.000000e+00 : f32
    %90 = vector.broadcast %cst_41 : f32 to vector<1x128xf32>
    %91 = arith.subf %70, %90 : vector<1x128xf32>
    %cst_42 = arith.constant 1.000000e+00 : f32
    %92 = vector.broadcast %cst_42 : f32 to vector<1x128xf32>
    %93 = arith.addf %70, %92 : vector<1x128xf32>
    %94 = tpu.reciprocal %93 {approx = true} : vector<1x128xf32> -> vector<1x128xf32>
    %95 = arith.mulf %93, %94 : vector<1x128xf32>
    %cst_43 = arith.constant 2.000000e+00 : f32
    %96 = vector.broadcast %cst_43 : f32 to vector<1x128xf32>
    %97 = arith.subf %96, %95 : vector<1x128xf32>
    %98 = arith.mulf %94, %97 : vector<1x128xf32>
    %cst_44 = arith.constant 1.000000e+30 : f32
    %99 = vector.broadcast %cst_44 : f32 to vector<1x128xf32>
    %100 = arith.cmpf oge, %93, %99 : vector<1x128xf32>
    %cst_45 = arith.constant 0.000000e+00 : f32
    %101 = vector.broadcast %cst_45 : f32 to vector<1x128xf32>
    %102 = arith.select %100, %101, %98 : vector<1x128xi1>, vector<1x128xf32>
    %cst_46 = arith.constant 0.000000e+00 : f32
    %103 = vector.broadcast %cst_46 : f32 to vector<1x128xf32>
    %104 = arith.cmpf oeq, %93, %103 : vector<1x128xf32>
    %cst_47 = arith.constant 0x7F800000 : f32
    %105 = vector.broadcast %cst_47 : f32 to vector<1x128xf32>
    %106 = arith.select %104, %105, %102 : vector<1x128xi1>, vector<1x128xf32>
    %107 = arith.mulf %91, %106 : vector<1x128xf32>
    %108 = arith.select %74, %107, %70 : vector<1x128xi1>, vector<1x128xf32>
    %109 = arith.select %72, %89, %108 : vector<1x128xi1>, vector<1x128xf32>
    %cst_48 = arith.constant 0.785398185 : f32
    %cst_49 = arith.constant 0.000000e+00 : f32
    %110 = vector.broadcast %cst_48 : f32 to vector<1x128xf32>
    %111 = vector.broadcast %cst_49 : f32 to vector<1x128xf32>
    %112 = arith.select %74, %110, %111 : vector<1x128xi1>, vector<1x128xf32>
    %cst_50 = arith.constant 1.57079637 : f32
    %113 = vector.broadcast %cst_50 : f32 to vector<1x128xf32>
    %114 = arith.select %72, %113, %112 : vector<1x128xi1>, vector<1x128xf32>
    %115 = arith.mulf %109, %109 : vector<1x128xf32>
    %cst_51 = arith.constant 0.0805374458 : f32
    %116 = vector.broadcast %cst_51 : f32 to vector<1x128xf32>
    %117 = arith.mulf %116, %115 : vector<1x128xf32>
    %cst_52 = arith.constant 0.138776854 : f32
    %118 = vector.broadcast %cst_52 : f32 to vector<1x128xf32>
    %119 = arith.subf %117, %118 : vector<1x128xf32>
    %120 = arith.mulf %119, %115 : vector<1x128xf32>
    %cst_53 = arith.constant 0.199777111 : f32
    %121 = vector.broadcast %cst_53 : f32 to vector<1x128xf32>
    %122 = arith.addf %120, %121 : vector<1x128xf32>
    %123 = arith.mulf %122, %115 : vector<1x128xf32>
    %cst_54 = arith.constant 0.333329499 : f32
    %124 = vector.broadcast %cst_54 : f32 to vector<1x128xf32>
    %125 = arith.subf %123, %124 : vector<1x128xf32>
    %126 = arith.mulf %125, %115 : vector<1x128xf32>
    %127 = arith.mulf %126, %109 : vector<1x128xf32>
    %128 = arith.addf %114, %127 : vector<1x128xf32>
    %129 = arith.addf %128, %109 : vector<1x128xf32>
    %cst_55 = arith.constant 0.000000e+00 : f32
    %130 = vector.broadcast %cst_55 : f32 to vector<1x128xf32>
    %131 = arith.cmpf olt, %69, %130 : vector<1x128xf32>
    %cst_56 = arith.constant 0.000000e+00 : f32
    %132 = vector.broadcast %cst_56 : f32 to vector<1x128xf32>
    %133 = arith.subf %132, %129 : vector<1x128xf32>
    %134 = arith.select %131, %133, %129 : vector<1x128xi1>, vector<1x128xf32>
    %cst_57 = arith.constant 325.94931 : f32
    %135 = vector.broadcast %cst_57 : f32 to vector<1x128xf32>
    %136 = arith.mulf %134, %135 : vector<1x128xf32>
    %c0_58 = arith.constant 0 : index
    %c0_59 = arith.constant 0 : index
    %c0_60 = arith.constant 0 : index
    %137 = vector.load %arg4[%c0_58, %c0_59, %c0_60] : memref<2x1x128xf32, #tpu.memory_space<vmem>>, vector<1x1x128xf32>
    %138 = vector.shape_cast %137 : vector<1x1x128xf32> to vector<1x128xf32>
    %139 = vector.shape_cast %136 : vector<1x128xf32> to vector<1x1x128xf32>
    tpu.vector_store %arg4[%c0_58, %c0_59, %c0_60], %139 {strides = array<i32>} : memref<2x1x128xf32, #tpu.memory_space<vmem>>, vector<1x1x128xf32>,
    %140 = arith.mulf %19, %19 : vector<1x128xf32>
    %141 = arith.mulf %47, %47 : vector<1x128xf32>
    %142 = arith.addf %140, %141 : vector<1x128xf32>
    %143 = math.sqrt %142 : vector<1x128xf32>
    %144 = tpu.reciprocal %143 {approx = true} : vector<1x128xf32> -> vector<1x128xf32>
    %145 = arith.mulf %143, %144 : vector<1x128xf32>
    %cst_61 = arith.constant 2.000000e+00 : f32
    %146 = vector.broadcast %cst_61 : f32 to vector<1x128xf32>
    %147 = arith.subf %146, %145 : vector<1x128xf32>
    %148 = arith.mulf %144, %147 : vector<1x128xf32>
    %cst_62 = arith.constant 1.000000e+30 : f32
    %149 = vector.broadcast %cst_62 : f32 to vector<1x128xf32>
    %150 = arith.cmpf oge, %143, %149 : vector<1x128xf32>
    %cst_63 = arith.constant 0.000000e+00 : f32
    %151 = vector.broadcast %cst_63 : f32 to vector<1x128xf32>
    %152 = arith.select %150, %151, %148 : vector<1x128xi1>, vector<1x128xf32>
    %cst_64 = arith.constant 0.000000e+00 : f32
    %153 = vector.broadcast %cst_64 : f32 to vector<1x128xf32>
    %154 = arith.cmpf oeq, %143, %153 : vector<1x128xf32>
    %cst_65 = arith.constant 0x7F800000 : f32
    %155 = vector.broadcast %cst_65 : f32 to vector<1x128xf32>
    %156 = arith.select %154, %155, %152 : vector<1x128xi1>, vector<1x128xf32>
    %157 = arith.mulf %49, %156 : vector<1x128xf32>
    %158 = math.absf %157 : vector<1x128xf32>
    %cst_66 = arith.constant 2.41421366 : f32
    %159 = vector.broadcast %cst_66 : f32 to vector<1x128xf32>
    %160 = arith.cmpf ogt, %158, %159 : vector<1x128xf32>
    %cst_67 = arith.constant 0.414213568 : f32
    %161 = vector.broadcast %cst_67 : f32 to vector<1x128xf32>
    %162 = arith.cmpf ogt, %158, %161 : vector<1x128xf32>
    %163 = tpu.reciprocal %158 {approx = true} : vector<1x128xf32> -> vector<1x128xf32>
    %164 = arith.mulf %158, %163 : vector<1x128xf32>
    %cst_68 = arith.constant 2.000000e+00 : f32
    %165 = vector.broadcast %cst_68 : f32 to vector<1x128xf32>
    %166 = arith.subf %165, %164 : vector<1x128xf32>
    %167 = arith.mulf %163, %166 : vector<1x128xf32>
    %cst_69 = arith.constant 1.000000e+30 : f32
    %168 = vector.broadcast %cst_69 : f32 to vector<1x128xf32>
    %169 = arith.cmpf oge, %158, %168 : vector<1x128xf32>
    %cst_70 = arith.constant 0.000000e+00 : f32
    %170 = vector.broadcast %cst_70 : f32 to vector<1x128xf32>
    %171 = arith.select %169, %170, %167 : vector<1x128xi1>, vector<1x128xf32>
    %cst_71 = arith.constant 0.000000e+00 : f32
    %172 = vector.broadcast %cst_71 : f32 to vector<1x128xf32>
    %173 = arith.cmpf oeq, %158, %172 : vector<1x128xf32>
    %cst_72 = arith.constant 0x7F800000 : f32
    %174 = vector.broadcast %cst_72 : f32 to vector<1x128xf32>
    %175 = arith.select %173, %174, %171 : vector<1x128xi1>, vector<1x128xf32>
    %cst_73 = arith.constant 0.000000e+00 : f32
    %176 = vector.broadcast %cst_73 : f32 to vector<1x128xf32>
    %177 = arith.subf %176, %175 : vector<1x128xf32>
    %cst_74 = arith.constant 1.000000e+00 : f32
    %178 = vector.broadcast %cst_74 : f32 to vector<1x128xf32>
    %179 = arith.subf %158, %178 : vector<1x128xf32>
    %cst_75 = arith.constant 1.000000e+00 : f32
    %180 = vector.broadcast %cst_75 : f32 to vector<1x128xf32>
    %181 = arith.addf %158, %180 : vector<1x128xf32>
    %182 = tpu.reciprocal %181 {approx = true} : vector<1x128xf32> -> vector<1x128xf32>
    %183 = arith.mulf %181, %182 : vector<1x128xf32>
    %cst_76 = arith.constant 2.000000e+00 : f32
    %184 = vector.broadcast %cst_76 : f32 to vector<1x128xf32>
    %185 = arith.subf %184, %183 : vector<1x128xf32>
    %186 = arith.mulf %182, %185 : vector<1x128xf32>
    %cst_77 = arith.constant 1.000000e+30 : f32
    %187 = vector.broadcast %cst_77 : f32 to vector<1x128xf32>
    %188 = arith.cmpf oge, %181, %187 : vector<1x128xf32>
    %cst_78 = arith.constant 0.000000e+00 : f32
    %189 = vector.broadcast %cst_78 : f32 to vector<1x128xf32>
    %190 = arith.select %188, %189, %186 : vector<1x128xi1>, vector<1x128xf32>
    %cst_79 = arith.constant 0.000000e+00 : f32
    %191 = vector.broadcast %cst_79 : f32 to vector<1x128xf32>
    %192 = arith.cmpf oeq, %181, %191 : vector<1x128xf32>
    %cst_80 = arith.constant 0x7F800000 : f32
    %193 = vector.broadcast %cst_80 : f32 to vector<1x128xf32>
    %194 = arith.select %192, %193, %190 : vector<1x128xi1>, vector<1x128xf32>
    %195 = arith.mulf %179, %194 : vector<1x128xf32>
    %196 = arith.select %162, %195, %158 : vector<1x128xi1>, vector<1x128xf32>
    %197 = arith.select %160, %177, %196 : vector<1x128xi1>, vector<1x128xf32>
    %cst_81 = arith.constant 0.785398185 : f32
    %cst_82 = arith.constant 0.000000e+00 : f32
    %198 = vector.broadcast %cst_81 : f32 to vector<1x128xf32>
    %199 = vector.broadcast %cst_82 : f32 to vector<1x128xf32>
    %200 = arith.select %162, %198, %199 : vector<1x128xi1>, vector<1x128xf32>
    %cst_83 = arith.constant 1.57079637 : f32
    %201 = vector.broadcast %cst_83 : f32 to vector<1x128xf32>
    %202 = arith.select %160, %201, %200 : vector<1x128xi1>, vector<1x128xf32>
    %203 = arith.mulf %197, %197 : vector<1x128xf32>
    %cst_84 = arith.constant 0.0805374458 : f32
    %204 = vector.broadcast %cst_84 : f32 to vector<1x128xf32>
    %205 = arith.mulf %204, %203 : vector<1x128xf32>
    %cst_85 = arith.constant 0.138776854 : f32
    %206 = vector.broadcast %cst_85 : f32 to vector<1x128xf32>
    %207 = arith.subf %205, %206 : vector<1x128xf32>
    %208 = arith.mulf %207, %203 : vector<1x128xf32>
    %cst_86 = arith.constant 0.199777111 : f32
    %209 = vector.broadcast %cst_86 : f32 to vector<1x128xf32>
    %210 = arith.addf %208, %209 : vector<1x128xf32>
    %211 = arith.mulf %210, %203 : vector<1x128xf32>
    %cst_87 = arith.constant 0.333329499 : f32
    %212 = vector.broadcast %cst_87 : f32 to vector<1x128xf32>
    %213 = arith.subf %211, %212 : vector<1x128xf32>
    %214 = arith.mulf %213, %203 : vector<1x128xf32>
    %215 = arith.mulf %214, %197 : vector<1x128xf32>
    %216 = arith.addf %202, %215 : vector<1x128xf32>
    %217 = arith.addf %216, %197 : vector<1x128xf32>
    %cst_88 = arith.constant 0.000000e+00 : f32
    %218 = vector.broadcast %cst_88 : f32 to vector<1x128xf32>
    %219 = arith.cmpf olt, %157, %218 : vector<1x128xf32>
    %cst_89 = arith.constant 0.000000e+00 : f32
    %220 = vector.broadcast %cst_89 : f32 to vector<1x128xf32>
    %221 = arith.subf %220, %217 : vector<1x128xf32>
    %222 = arith.select %219, %221, %217 : vector<1x128xi1>, vector<1x128xf32>
    %cst_90 = arith.constant 325.94931 : f32
    %223 = vector.broadcast %cst_90 : f32 to vector<1x128xf32>
    %224 = arith.mulf %222, %223 : vector<1x128xf32>
    %c1_91 = arith.constant 1 : index
    %c0_92 = arith.constant 0 : index
    %c0_93 = arith.constant 0 : index
    %225 = vector.load %arg4[%c1_91, %c0_92, %c0_93] : memref<2x1x128xf32, #tpu.memory_space<vmem>>, vector<1x1x128xf32>
    %226 = vector.shape_cast %225 : vector<1x1x128xf32> to vector<1x128xf32>
    %227 = vector.shape_cast %224 : vector<1x128xf32> to vector<1x1x128xf32>
    tpu.vector_store %arg4[%c1_91, %c0_92, %c0_93], %227 {strides = array<i32>} : memref<2x1x128xf32, #tpu.memory_space<vmem>>, vector<1x1x128xf32>,
    return
  }
  func.func @transform_0(%arg0: i32) -> (i32, i32, i32) {
    %c0_i32 = arith.constant 0 : i32
    %c0_i32_0 = arith.constant 0 : i32
    %c0_i32_1 = arith.constant 0 : i32
    return %c0_i32, %arg0, %c0_i32_0 : i32, i32, i32
  }
  func.func @transform_1(%arg0: i32) -> (i32, i32) {
    %c0_i32 = arith.constant 0 : i32
    %c0_i32_0 = arith.constant 0 : i32
    %c0_i32_1 = arith.constant 0 : i32
    return %c0_i32, %c0_i32_0 : i32, i32
  }
  func.func @transform_2(%arg0: i32) -> i32 {
    %c0_i32 = arith.constant 0 : i32
    %c0_i32_0 = arith.constant 0 : i32
    return %c0_i32 : i32
  }
  func.func @transform_3(%arg0: i32) -> (i32, i32, i32) {
    %c0_i32 = arith.constant 0 : i32
    %c0_i32_0 = arith.constant 0 : i32
    %c0_i32_1 = arith.constant 0 : i32
    return %c0_i32, %arg0, %c0_i32_0 : i32, i32, i32
  }
}

</mosaic_0001>

<bundles_post_ra>
// kernel: dest_step_forward.1
= control target key start
LH: loop header
LB: loop body
LE: loop exit
PB: predicated region body
PF: predicated region fallthrough
CT: control target
= control target key end

     0   :  { %8 = vsyncpa [#allocation3], 0  ;;  %s377_s0 = inlined_call_operand.vmem [shape: f32[3,1,128], index: 0, kind: input, shape index: {}]   ;;  %s378_s1 = inlined_call_operand.vmem [shape: f32[3,3], index: 1, kind: input, shape index: {}]   ;;  %s379_s2 = inlined_call_operand.vmem [shape: f32[3], index: 2, kind: input, shape index: {}]   ;;  %s380_s3 = inlined_call_operand.vmem [shape: f32[2,1,128], index: 3, kind: output, shape index: {}]  }
   0x1   :  { %s18_s14 = sshll.u32 %s378_s1, 4  ;;  %s19_s14 = int_to_ptr.vmem [resolvable:$true] %s18_s14 }
   0x2   :  { %9 = vsyncpa [#allocation5], 0  ;;  %s28_s17 = sshll.u32 %s379_s2, 4  ;;  %s256_s18 = scalar_lea.vmem %s19_s14, 64  ;;  %s29_s17 = int_to_ptr.vmem [resolvable:$true] %s28_s17 }
   0x3   :  { %p257_p0 = scmp.ne.s32.totalorder %s19_s14, %s256_s18  ;;  %p261_p1 = scmp.lt.s32.totalorder %s19_s14, %s19_s14 }
   0x4   :  { %p262_p2 = scmp.lt.s32.totalorder %s256_s18, %s256_s18 }
   0x6   :  { %p263_p3 = por %p262_p2, %p261_p1 }
   0x8   :  { %p264_p4 = pnand %p263_p3, %p257_p0 }
   0xa   :  { %267 = shalt.err (!%p264_p4)
}
   0xb   :  { %s284_s19 = smov [#allocation2]   ;;  %s268_s20 = scalar_lea.vmem %s29_s17, 16 }
   0xc   :  { %21 = dma.vmem_to_smem %s19_s14, 64, %s284_s19, [#allocation3]  }
   0xd   :  { %p269_p5 = scmp.ne.s32.totalorder %s29_s17, %s268_s20  ;;  %p273_p6 = scmp.lt.s32.totalorder %s29_s17, %s29_s17 }
   0xe   :  { %p274_p7 = scmp.lt.s32.totalorder %s268_s20, %s268_s20 }
  0x10   :  { %p275_p8 = por %p274_p7, %p273_p6 }
  0x12   :  { %p276_p9 = pnand %p275_p8, %p269_p5 }
  0x14   :  { %279 = shalt.err (!%p276_p9)
}
  0x15   :  { %s285_s1 = smov [#allocation4]  }
  0x16   :  { %31 = dma.vmem_to_smem %s29_s17, 16, %s285_s1, [#allocation5]  }
  0x17   :  { %280 = dma.done.wait [#allocation3], 64  }
  0x18   :  { %281 = vsyncadd [#allocation3], 4294967232 }
  0x19   :  { %282 = dma.done.wait [#allocation5], 16  }
  0x1a   :  { %283 = vsyncadd [#allocation5], 4294967280 }
  0x1b   :  { %38 = sfence }
  0x1c   :  { %s44_s2 = sld [smem:[#allocation2]]  ;;  %v39_v0 = vld [vmem:[%s377_s0] sm:$0x1]  ;;  %v218_v2 = vld [vmem:[%s377_s0 + $0x1] sm:$0x1] }
  0x1d   :  { %s220_s21 = sld [smem:[#allocation2 + $0x1]]  ;;  %v219_v7 = vld [vmem:[%s377_s0 + $0x2] sm:$0x1] }
  0x1e   :  { %s221_s22 = sld [smem:[#allocation2 + $0x2]] }
  0x1f   :  { %s313_s23 = sld [smem:[#allocation4]] }
  0x20   :  { %s222_s24 = sld [smem:[#allocation2 + $0x80]] }
  0x21   :  { %s223_s25 = sld [smem:[#allocation2 + $0x81]] }
  0x22   :  { %v45_v1 = vstv %s44_s2  ;;  %s224_s28 = sld [smem:[#allocation2 + $0x82]] }
  0x23   :  { %v46_v3 = vmul.f32 %v45_v1, %v39_v0  ;;  %v48_v4 = vstv %s220_s21  ;;  %s225_s4 = sld [smem:[#allocation4 + $0x1]] }
  0x24   :  { %v49_v5 = vmul.f32 %v218_v2, %v48_v4  ;;  %v52_v6 = vstv %s221_s22  ;;  %s226_s5 = sld [smem:[#allocation2 + $0x100]] }
  0x25   :  { %s227_s8 = sld [smem:[#allocation2 + $0x101]]  ;;  %v53_v9 = vmul.f32 %v219_v7, %v52_v6  ;;  %v56_v19 = vstv %s313_s23 }
  0x26   :  { %v50_v8 = vadd.f32 %v49_v5, %v46_v3  ;;  %v59_v10 = vstv %s222_s24  ;;  %s228_s9 = sld [smem:[#allocation2 + $0x102]] }
  0x27   :  { %v60_v11 = vmul.f32 %v59_v10, %v39_v0  ;;  %v62_v12 = vstv %s223_s25  ;;  %s229_s10 = sld [smem:[#allocation4 + $0x2]] }
  0x28   :  { %v63_v13 = vmul.f32 %v218_v2, %v62_v12  ;;  %v66_v14 = vstv %s224_s28  ;;  %v54_v16 = vadd.f32 %v53_v9, %v50_v8 }
  0x29   :  { %v67_v15 = vmul.f32 %v219_v7, %v66_v14  ;;  %v70_v20 = vstv %s225_s4 }
  0x2a   :  { %v64_v17 = vadd.f32 %v63_v13, %v60_v11  ;;  %v73_v18 = vstv %s226_s5  ;;  %v57_v27 = vadd.f32 %v56_v19, %v54_v16 }
  0x2b   :  { %v74_v21 = vmul.f32 %v73_v18, %v39_v0  ;;  %v76_v22 = vstv %s227_s8 }
  0x2c   :  { %v68_v23 = vadd.f32 %v67_v15, %v64_v17  ;;  %v77_v24 = vmul.f32 %v218_v2, %v76_v22  ;;  %v80_v25 = vstv %s228_s9  ;;  %v150_v35 = vmul.f32 %v57_v27, %v57_v27 }
  0x2d   :  { %v81_v26 = vmul.f32 %v219_v7, %v80_v25  ;;  %v84_v30 = vstv %s229_s10 }
  0x2e   :  { %v71_v28 = vadd.f32 %v70_v20, %v68_v23  ;;  %v78_v29 = vadd.f32 %v77_v24, %v74_v21 }
  0x30   :  { %v82_v31 = vadd.f32 %v81_v26, %v78_v29  ;;  %v86_v32 = vadd.f32 1.5, %v71_v28 }
  0x32   :  { %v85_v33 = vadd.f32 %v84_v30, %v82_v31  ;;  %v87_v34 = vmul.f32 %v86_v32, %v86_v32 }
  0x34   :  { %v88_v36 = vmul.f32 %v85_v33, %v85_v33 }
  0x36   :  { %v89_v37 = vadd.f32 %v88_v36, %v87_v34  ;;  %v151_v38 = vadd.f32 %v150_v35, %v88_v36 }
  0x38   :  { %240 = vrsqrt.f32 %v89_v37  ;;  %vm92_vm0 = vcmp.eq.f32.partialorder %v89_v37, inf  ;;  %v95_v40 = vand.u32 2147483648, %v89_v37  ;;  %vm94_vm1 = vcmp.eq.f32.partialorder %v89_v37, 0.0 }
  0x39   :  { %242 = vrsqrt.f32 %v151_v38  ;;  %vm154_vm2 = vcmp.eq.f32.partialorder %v151_v38, inf  ;;  %v157_v43 = vand.u32 2147483648, %v151_v38  ;;  %vm156_vm3 = vcmp.eq.f32.partialorder %v151_v38, 0.0 }
  0x45   :  { %v241_v39 = vpop.eup %240 }
  0x46   :  { %v243_v41 = vpop.eup %242  ;;  %v91_v42 = vmul.f32 %v241_v39, %v89_v37 }
  0x47   :  { %v153_v44 = vmul.f32 %v243_v41, %v151_v38 }
  0x48   :  { %v93_v45 = vsel %vm92_vm0, %v89_v37, %v91_v42 }
  0x49   :  { %v96_v46 = vsel %vm94_vm1, %v95_v40, %v93_v45  ;;  %v155_v47 = vsel %vm154_vm2, %v151_v38, %v153_v44 }
  0x4a   :  { %v97_v48 = vadd.f32 1.5, %v96_v46  ;;  %v158_v49 = vsel %vm156_vm3, %v157_v43, %v155_v47 }
  0x4b   :  { %244 = vrcp.f32 %v158_v49  ;;  %vm163_vm4 = vcmp.ge.f32.partialorder %v158_v49, 1e+30  ;;  %vm165_vm6 = vcmp.eq.f32.partialorder %v158_v49, 0.0 }
  0x4c   :  { %246 = vrcp.f32 %v97_v48  ;;  %vm102_vm5 = vcmp.ge.f32.partialorder %v97_v48, 1e+30  ;;  %vm104_vm7 = vcmp.eq.f32.partialorder %v97_v48, 0.0 }
  0x58   :  { %v245_v50 = vpop.eup %244 }
  0x59   :  { %v247_v51 = vpop.eup %246  ;;  %v160_v52 = vmul.f32 %v245_v50, %v158_v49 }
  0x5a   :  { %v99_v53 = vmul.f32 %v247_v51, %v97_v48 }
  0x5b   :  { %v161_v54 = vsub.f32 2.0, %v160_v52 }
  0x5c   :  { %v100_v55 = vsub.f32 2.0, %v99_v53 }
  0x5d   :  { %v162_v56 = vmul.f32 %v245_v50, %v161_v54  ;;  %v286_v50 = vmov 0.0  }
  0x5e   :  { %v101_v57 = vmul.f32 %v247_v51, %v100_v55 }
  0x5f   :  { %v164_v58 = vsel %vm163_vm4, 0.0, %v162_v56 }
  0x60   :  { %v103_v59 = vsel %vm102_vm5, 0.0, %v101_v57  ;;  %v166_v60 = vsel %vm165_vm6, inf, %v164_v58 }
  0x61   :  { %v105_v61 = vsel %vm104_vm7, inf, %v103_v59  ;;  %v325_v62 = vmul.f32 %v166_v60, %v86_v32 }
  0x62   :  { %v327_v63 = vmul.f32 %v105_v61, %v57_v27 }
  0x63   :  { %v330_v0 = vand.u32 2147483647, %v325_v62  ;;  %vm206_vm5 = vcmp.lt.f32.partialorder %v325_v62, 0.0 }
  0x64   :  { %v333_v1 = vand.u32 2147483647, %v327_v63  ;;  %vm145_vm4 = vcmp.lt.f32.partialorder %v327_v63, 0.0 }
  0x65   :  { %248 = vrcp.f32 %v330_v0  ;;  %v181_v3 = vadd.f32 1.0, %v330_v0  ;;  %vm175_vm8 = vcmp.ge.f32.partialorder %v330_v0, 1e+30  ;;  %vm177_vm11 = vcmp.eq.f32.partialorder %v330_v0, 0.0 }
  0x66   :  { %250 = vrcp.f32 %v333_v1  ;;  %v120_v2 = vadd.f32 1.0, %v333_v1  ;;  %vm114_vm9 = vcmp.ge.f32.partialorder %v333_v1, 1e+30  ;;  %vm116_vm10 = vcmp.eq.f32.partialorder %v333_v1, 0.0 }
  0x67   :  { %v230_v19 = vadd.f32 -1.0, %v333_v1  ;;  %vm186_vm14 = vcmp.ge.f32.partialorder %v181_v3, 1e+30  ;;  %v233_v24 = vadd.f32 -1.0, %v330_v0  ;;  %vm188_vm15 = vcmp.eq.f32.partialorder %v181_v3, 0.0 }
  0x68   :  { %252 = vrcp.f32 %v120_v2  ;;  %vm125_vm12 = vcmp.ge.f32.partialorder %v120_v2, 1e+30  ;;  %vm127_vm13 = vcmp.eq.f32.partialorder %v120_v2, 0.0  ;;  %vm170_vm0 = vcmp.gt.f32.partialorder %v330_v0, 0.41421357 }
  0x69   :  { %254 = vrcp.f32 %v181_v3  ;;  %vm109_vm1 = vcmp.gt.f32.partialorder %v333_v1, 0.41421357  ;;  %vm108_vm2 = vcmp.gt.f32.partialorder %v333_v1, 2.4142137  ;;  %vm169_vm3 = vcmp.gt.f32.partialorder %v330_v0, 2.4142137 }
  0x6a   :  { %v132_v51 = vsel %vm109_vm1, 0.7853982, %v286_v50  ;;  %v193_v53 = vsel %vm170_vm0, 0.7853982, %v286_v50 }
  0x6b   :  { %v133_v56 = vsel %vm108_vm2, 1.5707964, %v132_v51  ;;  %v194_v59 = vsel %vm169_vm3, 1.5707964, %v193_v53 }
  0x72   :  { %v249_v4 = vpop.eup %248 }
  0x73   :  { %v251_v5 = vpop.eup %250  ;;  %v172_v6 = vmul.f32 %v249_v4, %v330_v0 }
  0x74   :  { %v111_v7 = vmul.f32 %v251_v5, %v333_v1 }
  0x75   :  { %v173_v8 = vsub.f32 2.0, %v172_v6  ;;  %v253_v9 = vpop.eup %252 }
  0x76   :  { %v112_v10 = vsub.f32 2.0, %v111_v7  ;;  %v255_v11 = vpop.eup %254  ;;  %v122_v12 = vmul.f32 %v253_v9, %v120_v2 }
  0x77   :  { %v174_v13 = vmul.f32 %v249_v4, %v173_v8  ;;  %v183_v15 = vmul.f32 %v255_v11, %v181_v3 }
  0x78   :  { %v113_v14 = vmul.f32 %v251_v5, %v112_v10  ;;  %v123_v16 = vsub.f32 2.0, %v122_v12 }
  0x79   :  { %v176_v17 = vsel %vm175_vm8, 0.0, %v174_v13  ;;  %v184_v20 = vsub.f32 2.0, %v183_v15 }
  0x7a   :  { %v115_v18 = vsel %vm114_vm9, 0.0, %v113_v14  ;;  %v124_v22 = vmul.f32 %v253_v9, %v123_v16  ;;  %v178_v23 = vsel %vm177_vm11, inf, %v176_v17 }
  0x7b   :  { %v117_v21 = vsel %vm116_vm10, inf, %v115_v18  ;;  %v185_v25 = vmul.f32 %v255_v11, %v184_v20  ;;  %v179_v31 = vsub.f32 0.0, %v178_v23 }
  0x7c   :  { %v126_v26 = vsel %vm125_vm12, 0.0, %v124_v22  ;;  %v118_v27 = vsub.f32 0.0, %v117_v21 }
  0x7d   :  { %v128_v28 = vsel %vm127_vm13, inf, %v126_v26  ;;  %v187_v29 = vsel %vm186_vm14, 0.0, %v185_v25 }
  0x7e   :  { %v129_v30 = vmul.f32 %v230_v19, %v128_v28  ;;  %v189_v32 = vsel %vm188_vm15, inf, %v187_v29 }
  0x7f   :  { %v190_v33 = vmul.f32 %v233_v24, %v189_v32 }
  0x80   :  { %v130_v34 = vsel %vm109_vm1, %v129_v30, %v333_v1 }
  0x81   :  { %v131_v35 = vsel %vm108_vm2, %v118_v27, %v130_v34  ;;  %v191_v36 = vsel %vm170_vm0, %v190_v33, %v330_v0 }
  0x82   :  { %v134_v37 = vmul.f32 %v131_v35, %v131_v35  ;;  %v192_v38 = vsel %vm169_vm3, %v179_v31, %v191_v36 }
  0x83   :  { %v195_v39 = vmul.f32 %v192_v38, %v192_v38 }
  0x84   :  { %v135_v40 = vmul.f32 0.080537446, %v134_v37 }
  0x85   :  { %v196_v41 = vmul.f32 0.080537446, %v195_v39 }
  0x86   :  { %v231_v42 = vadd.f32 -0.13877685, %v135_v40 }
  0x87   :  { %v234_v43 = vadd.f32 -0.13877685, %v196_v41 }
  0x88   :  { %v137_v44 = vmul.f32 %v231_v42, %v134_v37 }
  0x89   :  { %v198_v45 = vmul.f32 %v234_v43, %v195_v39 }
  0x8a   :  { %v138_v46 = vadd.f32 0.19977711, %v137_v44 }
  0x8b   :  { %v199_v47 = vadd.f32 0.19977711, %v198_v45 }
  0x8c   :  { %v139_v48 = vmul.f32 %v138_v46, %v134_v37 }
  0x8d   :  { %v200_v49 = vmul.f32 %v199_v47, %v195_v39 }
  0x8e   :  { %v232_v52 = vadd.f32 -0.3333295, %v139_v48 }
  0x8f   :  { %v235_v54 = vadd.f32 -0.3333295, %v200_v49 }
  0x90   :  { %v141_v55 = vmul.f32 %v232_v52, %v134_v37 }
  0x91   :  { %v202_v57 = vmul.f32 %v235_v54, %v195_v39 }
  0x92   :  { %v142_v58 = vmul.f32 %v141_v55, %v131_v35 }
  0x93   :  { %v203_v60 = vmul.f32 %v202_v57, %v192_v38 }
  0x94   :  { %v143_v61 = vadd.f32 %v142_v58, %v133_v56 }
  0x95   :  { %v204_v2 = vadd.f32 %v203_v60, %v194_v59 }
  0x96   :  { %v144_v3 = vadd.f32 %v143_v61, %v131_v35 }
  0x97   :  { %v205_v4 = vadd.f32 %v204_v2, %v192_v38 }
  0x98   :  { %v146_v5 = vsub.f32 0.0, %v144_v3 }
  0x99   :  { %v207_v6 = vsub.f32 0.0, %v205_v4 }
  0x9a   :  { %v147_v7 = vsel %vm145_vm4, %v146_v5, %v144_v3 }
  0x9b   :  { %v148_v8 = vmul.f32 325.9493, %v147_v7  ;;  %v208_v1 = vsel %vm206_vm5, %v207_v6, %v205_v4 }
  0x9c   :  { %v209_v9 = vmul.f32 325.9493, %v208_v1 }
  0x9d   :  { %149 = vst [vmem:[%s380_s3] sm:$0x1] %v148_v8 }
  0x9e   :  { %236 = vst [vmem:[%s380_s3 + $0x1] sm:$0x1] %v209_v9 }
  0x9f   :  { %216 = vsyncpa [#allocation3], 1 }
  0xa0   :  { %217 = vsyncpa [#allocation5], 1 }

</bundles_post_ra>
